<compile_context>
chip_gen: v7x
topology: tpu7x:2x2x1
jax: 0.10.0
libtpu: 0.0.40
codegen_flags: <defaults>
</compile_context>

<pallas_src>
import functools

import jax
import jax.numpy as jnp
from jax import lax
from jax.experimental import pallas as pl
from jax.experimental.pallas import tpu as pltpu

# AdaptiveWingLoss constants (match the PyTorch module defaults / forward).
OMEGA = 14.0
THETA = 0.5
EPSILON = 1.0   # unused by this forward pass (kept for parity with __init__)
ALPHA = 2.1

# Pre-folded constants (no in-kernel divides).
_INV_OMEGA = 1.0 / OMEGA
_ALPHA_M1 = ALPHA - 1.0
_HALF_THETA = 0.5 * THETA
_ONE_THIRD = 1.0 / 3.0


# --------------------------------------------------------------------------
# Kernel
# --------------------------------------------------------------------------
def _awing_kernel(pred_ref, targ_ref, acc_ref, *, tile_r, cols, acc_rows,
                  total_rows, blocks_per_split):
    c = pl.program_id(0)   # split index ("parallel"; >1 only on multi-TC chips)
    i = pl.program_id(1)   # row-block index within the split ("arbitrary")

    # Zero the resident per-split accumulator at the start of its sweep.
    @pl.when(i == 0)
    def _():
        acc_ref[...] = jnp.zeros_like(acc_ref)

    row0 = (c * blocks_per_split + i) * tile_r

    def accumulate(mask_rows):
        p = pred_ref[...].astype(jnp.float32)
        t = targ_ref[...].astype(jnp.float32)
        delta = jnp.abs(t - p)

        # (delta/omega)^(alpha-1) via exp/log (2 EUP ops).  max() keeps the log
        # argument positive; delta == 0 yields ~1e-33 which is effectively 0.
        ratio = jnp.maximum(delta * _INV_OMEGA, 1e-30)
        powed = jnp.exp(_ALPHA_M1 * jnp.log(ratio))
        # log1p(powed) as a short polynomial: on the selected (delta < THETA)
        # branch powed <= (THETA/OMEGA)^(ALPHA-1) ~= 0.026 so 4 terms give
        # <1e-8 absolute error; the delta >= THETA branch discards loss1.
        log1p_powed = powed * (1.0 + powed * (-0.5 + powed *
                                              (_ONE_THIRD - 0.25 * powed)))
        loss1 = OMEGA * log1p_powed
        loss2 = OMEGA * (delta - _HALF_THETA)
        per_elem = jnp.where(delta < THETA, loss1, loss2)

        if mask_rows:
            # Ragged tail / phantom blocks: rows past the true extent (whose
            # block data is undefined) contribute exactly zero.
            row_ids = row0 + lax.broadcasted_iota(jnp.int32, per_elem.shape, 0)
            per_elem = jnp.where(row_ids < total_rows, per_elem, 0.0)

        if tile_r != acc_rows:
            # Pure-VALU tree reduction to (acc_rows, cols): splitting the
            # sublane dim in groups of 8 is layout-free, and sum(axis=0) is
            # just elementwise vreg adds (no XLU, no cross-lane movement).
            red = per_elem.reshape(tile_r // acc_rows, acc_rows, cols).sum(axis=0)
        else:
            red = per_elem
        acc_ref[...] += red[None]

    is_full = row0 + tile_r <= total_rows

    @pl.when(is_full)
    def _():
        accumulate(mask_rows=False)          # hot path: no mask work at all

    @pl.when(jnp.logical_not(is_full))
    def _():
        accumulate(mask_rows=True)


# --------------------------------------------------------------------------
# Planning helpers (plain Python, trace-time only)
# --------------------------------------------------------------------------
def _vmem_capacity_bytes():
    try:
        cap = getattr(pltpu.get_tpu_info(), "vmem_capacity_bytes", None)
        if cap:
            return int(cap)
    except Exception:
        pass
    return 64 * 1024 * 1024        # conservative default: v7x per-TC VMEM


def _default_num_splits():
    """2 only on chips with >1 TensorCore per device (v4/v5p megacore, v7x)."""
    try:
        kind = jax.devices()[0].device_kind.lower()
    except Exception:
        return 1
    return 2 if any(tag in kind for tag in ("v4", "v5p", "7")) else 1


def _plan_layout(shape):
    """Factor the flat element stream into a lane-dense (rows, cols)."""
    n = 1
    for d in shape:
        n *= int(d)
    for c in (512, 1024, 256, 128):          # lane-dense: multiple of 128
        if n % c == 0:
            return n // c, c
    cols = int(shape[-1])                    # fallback: natural trailing dim
    return n // cols, cols


def _choose_tile_rows(rows, row_bytes, block_bytes):
    """Rows per block: ~block_bytes per input block; multiple of 32."""
    target = max(1, block_bytes // max(1, row_bytes))
    if target >= rows or rows <= 32:
        return rows                          # a single block covers all rows
    return max(32, (int(target) // 32) * 32)


# --------------------------------------------------------------------------
# pallas_call wrapper
# --------------------------------------------------------------------------
@functools.partial(
    jax.jit,
    static_argnames=("rows", "cols", "tile_r", "acc_rows", "nblocks",
                     "blocks_per_split", "num_splits", "vmem_limit"))
def _awing_call(pred, target, *, rows, cols, tile_r, acc_rows, nblocks,
                blocks_per_split, num_splits, vmem_limit):
    p2 = pred.reshape(rows, cols)            # contiguous reshape, copy-free
    t2 = target.reshape(rows, cols)

    def in_map(c, i):
        # Clamp phantom blocks (odd nblocks under a 2-way split) onto the last
        # real block; the in-kernel row mask zeroes their contribution.
        return (jnp.minimum(c * blocks_per_split + i, nblocks - 1), 0)

    kernel = functools.partial(
        _awing_kernel, tile_r=tile_r, cols=cols, acc_rows=acc_rows,
        total_rows=rows, blocks_per_split=blocks_per_split)

    partials = pl.pallas_call(
        kernel,
        out_shape=jax.ShapeDtypeStruct((num_splits, acc_rows, cols),
                                       jnp.float32),
        grid_spec=pltpu.PrefetchScalarGridSpec(
            num_scalar_prefetch=0,
            grid=(num_splits, blocks_per_split),
            in_specs=[pl.BlockSpec((tile_r, cols), in_map),
                      pl.BlockSpec((tile_r, cols), in_map)],
            out_specs=pl.BlockSpec((1, acc_rows, cols), lambda c, i: (c, 0, 0)),
        ),
        compiler_params=pltpu.CompilerParams(
            # On a true 2-TensorCore chip (v7x / megacore) the leading
            # "parallel" axis (size 2 there) shards across cores; on 1-TC
            # chips num_splits == 1 so this is just a single pass.
            dimension_semantics=("parallel", "arbitrary"),
            vmem_limit_bytes=vmem_limit,
        ),
    )(p2, t2)

    # Tiny final reduce + mean: (loss1.sum() + loss2.sum()) / element count.
    return jnp.sum(partials) * jnp.float32(1.0 / float(rows * cols))


def adaptive_wing_loss(pred, target, *, block_bytes=None, num_splits=None):
    assert pred.shape == target.shape
    rows, cols = _plan_layout(pred.shape)

    vmem_cap = _vmem_capacity_bytes()
    if block_bytes is None:
        # Bigger blocks on 128 MiB-VMEM chips (v5e/v6e), smaller on v7x.
        block_bytes = (8 << 20) if vmem_cap >= (96 << 20) else (4 << 20)
    block_bytes = min(int(block_bytes), vmem_cap // 6)   # always leave headroom

    itemsize = jnp.dtype(pred.dtype).itemsize
    padded_cols = ((cols + 127) // 128) * 128
    tile_r = _choose_tile_rows(rows, padded_cols * itemsize, block_bytes)
    nblocks = pl.cdiv(rows, tile_r)

    if num_splits is None:
        num_splits = _default_num_splits()
    num_splits = max(1, min(int(num_splits), nblocks))
    blocks_per_split = pl.cdiv(nblocks, num_splits)

    acc_rows = 8 if tile_r % 8 == 0 else tile_r

    # Double-buffered inputs + resident accumulator(s) + slack, capped below
    # the physical VMEM of this chip generation.
    tile_bytes = tile_r * padded_cols * itemsize
    out_bytes = num_splits * acc_rows * padded_cols * 4
    footprint = 4 * tile_bytes + 2 * out_bytes + (2 << 20)
    vmem_limit = int(min(max(footprint, 16 << 20), (vmem_cap * 3) // 4))

    return _awing_call(pred, target, rows=rows, cols=cols, tile_r=tile_r,
                       acc_rows=acc_rows, nblocks=nblocks,
                       blocks_per_split=blocks_per_split,
                       num_splits=num_splits, vmem_limit=vmem_limit)


# --------------------------------------------------------------------------
# Pure-JAX reference (matches the PyTorch forward: mean over all elements)
# --------------------------------------------------------------------------
def _reference(pred, target):
    delta = jnp.abs(target - pred)
    loss1 = OMEGA * jnp.log1p(jnp.power(delta / OMEGA, ALPHA - 1.0))
    loss2 = OMEGA * (delta - THETA / 2.0)
    per = jnp.where(delta < THETA, loss1, loss2)
    return jnp.sum(per) / pred.size


if __name__ == "__main__":
    key = jax.random.PRNGKey(0)
    k1, k2 = jax.random.split(key)

    # (B, L, N) heatmaps; element count divides 512 -> lane-dense (8, 512).
    B, L, N = 2, 8, 256
    pred = jax.random.uniform(k1, (B, L, N), dtype=jnp.float32)
    target = jax.random.uniform(k2, (B, L, N), dtype=jnp.float32) * 2.0
    out = jax.block_until_ready(adaptive_wing_loss(pred, target))
    ref = _reference(pred, target)
    assert jnp.allclose(out, ref, rtol=1e-5, atol=1e-5), (out, ref)

    # Multi-block + ragged-tail (masked) path with a tiny forced block size:
    # 40 rows swept in 32-row blocks -> one full + one masked block per sweep.
    B2, L2, N2 = 4, 40, 128
    p2 = jax.random.uniform(k1, (B2, L2, N2), dtype=jnp.float32) * 1.5
    t2 = jax.random.uniform(k2, (B2, L2, N2), dtype=jnp.float32)
    out2 = jax.block_until_ready(
        adaptive_wing_loss(p2, t2, block_bytes=32 * 512 * 4))
    ref2 = _reference(p2, t2)
    assert jnp.allclose(out2, ref2, rtol=1e-5, atol=1e-5), (out2, ref2)

    # Fallback layout (element count not 128-divisible) + non-multiple-of-8
    # row count in a single full block.
    B3, L3, N3 = 3, 5, 7
    p3 = jax.random.uniform(k1, (B3, L3, N3), dtype=jnp.float32) * 2.0
    t3 = jax.random.uniform(k2, (B3, L3, N3), dtype=jnp.float32)
    out3 = jax.block_until_ready(adaptive_wing_loss(p3, t3))
    ref3 = _reference(p3, t3)
    assert jnp.allclose(out3, ref3, rtol=1e-5, atol=1e-5), (out3, ref3)

    # bf16 inputs accepted directly (upcast happens on-chip; halves HBM bytes).
    p4 = pred.astype(jnp.bfloat16)
    t4 = target.astype(jnp.bfloat16)
    out4 = jax.block_until_ready(adaptive_wing_loss(p4, t4))
    ref4 = _reference(p4.astype(jnp.float32), t4.astype(jnp.float32))
    assert jnp.allclose(out4, ref4, rtol=1e-4, atol=1e-4), (out4, ref4)

    print("KERNEL_OK")
</pallas_src>

<mosaic_0001>
module attributes {stable_mosaic.version = 11 : i64} {
  func.func @_awing_kernel(%arg0: i32, %arg1: i32, %arg2: memref<8x512xf32, #tpu.memory_space<vmem>>, %arg3: memref<8x512xf32, #tpu.memory_space<vmem>>, %arg4: memref<1x8x512xf32, #tpu.memory_space<vmem>>) attributes {dimension_semantics = [#tpu.dimension_semantics<parallel>, #tpu.dimension_semantics<arbitrary>], iteration_bounds = array<i64: 1, 1>, scalar_prefetch = 0 : i64, scratch_operands = 0 : i64, tpu.core_type = #tpu.core_type<tc>, window_params = [{transform_indices = @transform_0, window_bounds = array<i64: 8, 512>}, {transform_indices = @transform_1, window_bounds = array<i64: 8, 512>}, {transform_indices = @transform_2, window_bounds = array<i64: 1, 8, 512>}]} {
    %c0_i32 = arith.constant 0 : i32
    %0 = arith.cmpi eq, %arg1, %c0_i32 : i32
    %1 = arith.extui %0 : i1 to i32
    %c0_i32_0 = arith.constant 0 : i32
    %2 = arith.cmpi ne, %1, %c0_i32_0 : i32
    scf.if %2 {
      %cst = arith.constant 0.000000e+00 : f32
      %13 = vector.broadcast %cst : f32 to vector<1x8x512xf32>
      %c0 = arith.constant 0 : index
      %c0_5 = arith.constant 0 : index
      %c0_6 = arith.constant 0 : index
      %14 = vector.load %arg4[%c0, %c0_5, %c0_6] : memref<1x8x512xf32, #tpu.memory_space<vmem>>, vector<1x8x512xf32>
      tpu.vector_store %arg4[%c0, %c0_5, %c0_6], %13 {strides = array<i32>} : memref<1x8x512xf32, #tpu.memory_space<vmem>>, vector<1x8x512xf32>,
    } else {
    }
    %c1_i32 = arith.constant 1 : i32
    %3 = arith.muli %arg0, %c1_i32 : i32
    %4 = arith.addi %3, %arg1 : i32
    %c8_i32 = arith.constant 8 : i32
    %5 = arith.muli %4, %c8_i32 : i32
    %c8_i32_1 = arith.constant 8 : i32
    %6 = arith.addi %5, %c8_i32_1 : i32
    %c8_i32_2 = arith.constant 8 : i32
    %7 = arith.cmpi sle, %6, %c8_i32_2 : i32
    %8 = arith.extui %7 : i1 to i32
    %c0_i32_3 = arith.constant 0 : i32
    %9 = arith.cmpi ne, %8, %c0_i32_3 : i32
    scf.if %9 {
      %c0 = arith.constant 0 : index
      %c0_5 = arith.constant 0 : index
      %13 = vector.load %arg2[%c0, %c0_5] : memref<8x512xf32, #tpu.memory_space<vmem>>, vector<8x512xf32>
      %c0_6 = arith.constant 0 : index
      %c0_7 = arith.constant 0 : index
      %14 = vector.load %arg3[%c0_6, %c0_7] : memref<8x512xf32, #tpu.memory_space<vmem>>, vector<8x512xf32>
      %15 = arith.subf %14, %13 : vector<8x512xf32>
      %16 = math.absf %15 : vector<8x512xf32>
      %cst = arith.constant 0.0714285746 : f32
      %17 = vector.broadcast %cst : f32 to vector<8x512xf32>
      %18 = arith.mulf %16, %17 : vector<8x512xf32>
      %cst_8 = arith.constant 1.000000e-30 : f32
      %19 = vector.broadcast %cst_8 : f32 to vector<8x512xf32>
      %20 = arith.maximumf %18, %19 : vector<8x512xf32>
      %21 = math.log %20 : vector<8x512xf32>
      %cst_9 = arith.constant 1.100000e+00 : f32
      %22 = vector.broadcast %cst_9 : f32 to vector<8x512xf32>
      %23 = arith.mulf %22, %21 : vector<8x512xf32>
      %24 = math.exp %23 : vector<8x512xf32>
      %cst_10 = arith.constant 2.500000e-01 : f32
      %25 = vector.broadcast %cst_10 : f32 to vector<8x512xf32>
      %26 = arith.mulf %25, %24 : vector<8x512xf32>
      %cst_11 = arith.constant 0.333333343 : f32
      %27 = vector.broadcast %cst_11 : f32 to vector<8x512xf32>
      %28 = arith.subf %27, %26 : vector<8x512xf32>
      %29 = arith.mulf %24, %28 : vector<8x512xf32>
      %cst_12 = arith.constant -5.000000e-01 : f32
      %30 = vector.broadcast %cst_12 : f32 to vector<8x512xf32>
      %31 = arith.addf %30, %29 : vector<8x512xf32>
      %32 = arith.mulf %24, %31 : vector<8x512xf32>
      %cst_13 = arith.constant 1.000000e+00 : f32
      %33 = vector.broadcast %cst_13 : f32 to vector<8x512xf32>
      %34 = arith.addf %33, %32 : vector<8x512xf32>
      %35 = arith.mulf %24, %34 : vector<8x512xf32>
      %cst_14 = arith.constant 1.400000e+01 : f32
      %36 = vector.broadcast %cst_14 : f32 to vector<8x512xf32>
      %37 = arith.mulf %36, %35 : vector<8x512xf32>
      %cst_15 = arith.constant 2.500000e-01 : f32
      %38 = vector.broadcast %cst_15 : f32 to vector<8x512xf32>
      %39 = arith.subf %16, %38 : vector<8x512xf32>
      %cst_16 = arith.constant 1.400000e+01 : f32
      %40 = vector.broadcast %cst_16 : f32 to vector<8x512xf32>
      %41 = arith.mulf %40, %39 : vector<8x512xf32>
      %cst_17 = arith.constant 5.000000e-01 : f32
      %42 = vector.broadcast %cst_17 : f32 to vector<8x512xf32>
      %43 = arith.cmpf olt, %16, %42 : vector<8x512xf32>
      %44 = arith.select %43, %37, %41 : vector<8x512xi1>, vector<8x512xf32>
      %c0_18 = arith.constant 0 : index
      %c0_19 = arith.constant 0 : index
      %c0_20 = arith.constant 0 : index
      %45 = vector.load %arg4[%c0_18, %c0_19, %c0_20] : memref<1x8x512xf32, #tpu.memory_space<vmem>>, vector<1x8x512xf32>
      %46 = vector.shape_cast %44 : vector<8x512xf32> to vector<1x8x512xf32>
      %47 = arith.addf %45, %46 : vector<1x8x512xf32>
      %c0_21 = arith.constant 0 : index
      %c0_22 = arith.constant 0 : index
      %c0_23 = arith.constant 0 : index
      %48 = vector.load %arg4[%c0_21, %c0_22, %c0_23] : memref<1x8x512xf32, #tpu.memory_space<vmem>>, vector<1x8x512xf32>
      tpu.vector_store %arg4[%c0_21, %c0_22, %c0_23], %47 {strides = array<i32>} : memref<1x8x512xf32, #tpu.memory_space<vmem>>, vector<1x8x512xf32>,
    } else {
    }
    %true = arith.constant true
    %10 = arith.xori %7, %true : i1
    %11 = arith.extui %10 : i1 to i32
    %c0_i32_4 = arith.constant 0 : i32
    %12 = arith.cmpi ne, %11, %c0_i32_4 : i32
    scf.if %12 {
      %c0 = arith.constant 0 : index
      %c0_5 = arith.constant 0 : index
      %13 = vector.load %arg2[%c0, %c0_5] : memref<8x512xf32, #tpu.memory_space<vmem>>, vector<8x512xf32>
      %c0_6 = arith.constant 0 : index
      %c0_7 = arith.constant 0 : index
      %14 = vector.load %arg3[%c0_6, %c0_7] : memref<8x512xf32, #tpu.memory_space<vmem>>, vector<8x512xf32>
      %15 = arith.subf %14, %13 : vector<8x512xf32>
      %16 = math.absf %15 : vector<8x512xf32>
      %cst = arith.constant 0.0714285746 : f32
      %17 = vector.broadcast %cst : f32 to vector<8x512xf32>
      %18 = arith.mulf %16, %17 : vector<8x512xf32>
      %cst_8 = arith.constant 1.000000e-30 : f32
      %19 = vector.broadcast %cst_8 : f32 to vector<8x512xf32>
      %20 = arith.maximumf %18, %19 : vector<8x512xf32>
      %21 = math.log %20 : vector<8x512xf32>
      %cst_9 = arith.constant 1.100000e+00 : f32
      %22 = vector.broadcast %cst_9 : f32 to vector<8x512xf32>
      %23 = arith.mulf %22, %21 : vector<8x512xf32>
      %24 = math.exp %23 : vector<8x512xf32>
      %cst_10 = arith.constant 2.500000e-01 : f32
      %25 = vector.broadcast %cst_10 : f32 to vector<8x512xf32>
      %26 = arith.mulf %25, %24 : vector<8x512xf32>
      %cst_11 = arith.constant 0.333333343 : f32
      %27 = vector.broadcast %cst_11 : f32 to vector<8x512xf32>
      %28 = arith.subf %27, %26 : vector<8x512xf32>
      %29 = arith.mulf %24, %28 : vector<8x512xf32>
      %cst_12 = arith.constant -5.000000e-01 : f32
      %30 = vector.broadcast %cst_12 : f32 to vector<8x512xf32>
      %31 = arith.addf %30, %29 : vector<8x512xf32>
      %32 = arith.mulf %24, %31 : vector<8x512xf32>
      %cst_13 = arith.constant 1.000000e+00 : f32
      %33 = vector.broadcast %cst_13 : f32 to vector<8x512xf32>
      %34 = arith.addf %33, %32 : vector<8x512xf32>
      %35 = arith.mulf %24, %34 : vector<8x512xf32>
      %cst_14 = arith.constant 1.400000e+01 : f32
      %36 = vector.broadcast %cst_14 : f32 to vector<8x512xf32>
      %37 = arith.mulf %36, %35 : vector<8x512xf32>
      %cst_15 = arith.constant 2.500000e-01 : f32
      %38 = vector.broadcast %cst_15 : f32 to vector<8x512xf32>
      %39 = arith.subf %16, %38 : vector<8x512xf32>
      %cst_16 = arith.constant 1.400000e+01 : f32
      %40 = vector.broadcast %cst_16 : f32 to vector<8x512xf32>
      %41 = arith.mulf %40, %39 : vector<8x512xf32>
      %cst_17 = arith.constant 5.000000e-01 : f32
      %42 = vector.broadcast %cst_17 : f32 to vector<8x512xf32>
      %43 = arith.cmpf olt, %16, %42 : vector<8x512xf32>
      %44 = arith.select %43, %37, %41 : vector<8x512xi1>, vector<8x512xf32>
      %45 = tpu.iota {dimensions = array<i32: 0>} : vector<8x512xi32>
      %46 = vector.broadcast %5 : i32 to vector<8x512xi32>
      %47 = arith.addi %46, %45 : vector<8x512xi32>
      %c8_i32_18 = arith.constant 8 : i32
      %48 = vector.broadcast %c8_i32_18 : i32 to vector<8x512xi32>
      %49 = arith.cmpi slt, %47, %48 : vector<8x512xi32>
      %cst_19 = arith.constant 0.000000e+00 : f32
      %50 = vector.broadcast %cst_19 : f32 to vector<8x512xf32>
      %51 = arith.select %49, %44, %50 : vector<8x512xi1>, vector<8x512xf32>
      %c0_20 = arith.constant 0 : index
      %c0_21 = arith.constant 0 : index
      %c0_22 = arith.constant 0 : index
      %52 = vector.load %arg4[%c0_20, %c0_21, %c0_22] : memref<1x8x512xf32, #tpu.memory_space<vmem>>, vector<1x8x512xf32>
      %53 = vector.shape_cast %51 : vector<8x512xf32> to vector<1x8x512xf32>
      %54 = arith.addf %52, %53 : vector<1x8x512xf32>
      %c0_23 = arith.constant 0 : index
      %c0_24 = arith.constant 0 : index
      %c0_25 = arith.constant 0 : index
      %55 = vector.load %arg4[%c0_23, %c0_24, %c0_25] : memref<1x8x512xf32, #tpu.memory_space<vmem>>, vector<1x8x512xf32>
      tpu.vector_store %arg4[%c0_23, %c0_24, %c0_25], %54 {strides = array<i32>} : memref<1x8x512xf32, #tpu.memory_space<vmem>>, vector<1x8x512xf32>,
    } else {
    }
    return
  }
  func.func @transform_0(%arg0: i32, %arg1: i32) -> (i32, i32) {
    %c1_i32 = arith.constant 1 : i32
    %0 = arith.muli %arg0, %c1_i32 : i32
    %1 = arith.addi %0, %arg1 : i32
    %c0_i32 = arith.constant 0 : i32
    %2 = arith.minsi %1, %c0_i32 : i32
    %c0_i32_0 = arith.constant 0 : i32
    %c0_i32_1 = arith.constant 0 : i32
    return %2, %c0_i32_0 : i32, i32
  }
  func.func @transform_1(%arg0: i32, %arg1: i32) -> (i32, i32) {
    %c1_i32 = arith.constant 1 : i32
    %0 = arith.muli %arg0, %c1_i32 : i32
    %1 = arith.addi %0, %arg1 : i32
    %c0_i32 = arith.constant 0 : i32
    %2 = arith.minsi %1, %c0_i32 : i32
    %c0_i32_0 = arith.constant 0 : i32
    %c0_i32_1 = arith.constant 0 : i32
    return %2, %c0_i32_0 : i32, i32
  }
  func.func @transform_2(%arg0: i32, %arg1: i32) -> (i32, i32, i32) {
    %c0_i32 = arith.constant 0 : i32
    %c0_i32_0 = arith.constant 0 : i32
    %c0_i32_1 = arith.constant 0 : i32
    return %arg0, %c0_i32, %c0_i32_0 : i32, i32, i32
  }
}

</mosaic_0001>

<bundles_post_ra>
// kernel: _awing_call.1
= control target key start
LH: loop header
LB: loop body
LE: loop exit
PB: predicated region body
PF: predicated region fallthrough
CT: control target
= control target key end

     0   :  { %s419_s0 = inlined_call_operand.vmem [shape: f32[8,512], index: 0, kind: input, shape index: {}]   ;;  %s420_s1 = inlined_call_operand.vmem [shape: f32[8,512], index: 1, kind: input, shape index: {}]   ;;  %s421_s2 = inlined_call_operand.vmem [shape: f32[1,8,512], index: 2, kind: output, shape index: {}]  }
   0x1   :  { %v86_v0 = vld [vmem:[%s419_s0] sm:$0xff]  ;;  %v87_v2 = vld [vmem:[%s419_s0 + $0x8] sm:$0xff]  ;;  %v88_v5 = vld [vmem:[%s419_s0 + $0x10] sm:$0xff] }
   0x2   :  { %v90_v1 = vld [vmem:[%s420_s1] sm:$0xff]  ;;  %v91_v4 = vld [vmem:[%s420_s1 + $0x8] sm:$0xff]  ;;  %v92_v6 = vld [vmem:[%s420_s1 + $0x10] sm:$0xff] }
   0x3   :  { %v94_v3 = vsub.f32 %v90_v1, %v86_v0  ;;  %v95_v7 = vsub.f32 %v91_v4, %v87_v2  ;;  %v96_v8 = vsub.f32 %v92_v6, %v88_v5  ;;  %v89_v9 = vld [vmem:[%s419_s0 + $0x18] sm:$0xff] }
   0x4   :  { %v93_v10 = vld [vmem:[%s420_s1 + $0x18] sm:$0xff] }
   0x5   :  { %v387_v11 = vand.u32 2147483647, %v94_v3  ;;  %v97_v12 = vsub.f32 %v93_v10, %v89_v9  ;;  %v389_v13 = vand.u32 2147483647, %v95_v7  ;;  %v391_v14 = vand.u32 2147483647, %v96_v8 }
   0x7   :  { %v102_v15 = vmul.f32 0.071428575, %v387_v11  ;;  %v394_v16 = vand.u32 2147483647, %v97_v12  ;;  %v103_v17 = vmul.f32 0.071428575, %v389_v13 }
   0x8   :  { %v104_v18 = vmul.f32 0.071428575, %v391_v14  ;;  %v323_v56 = vadd.f32 -0.25, %v387_v11  ;;  %v324_v62 = vadd.f32 -0.25, %v389_v13  ;;  %v325_v1 = vadd.f32 -0.25, %v391_v14 }
   0x9   :  { %v106_v19 = vmax.f32 %v102_v15, 1e-30  ;;  %v107_v20 = vmax.f32 %v103_v17, 1e-30  ;;  %v105_v22 = vmul.f32 0.071428575, %v394_v16 }
   0xa   :  { %v108_v21 = vmax.f32 %v104_v18, 1e-30  ;;  %v166_v3 = vmul.f32 14.0, %v323_v56  ;;  %v326_v8 = vadd.f32 -0.25, %v394_v16  ;;  %vm170_vm0 = vcmp.lt.f32.partialorder %v387_v11, 0.5 }
   0xb   :  { %332 = vlog2.f32 %v106_v19  ;;  %v109_v23 = vmax.f32 %v105_v22, 1e-30  ;;  %v167_v10 = vmul.f32 14.0, %v324_v62  ;;  %vm171_vm1 = vcmp.lt.f32.partialorder %v389_v13, 0.5 }
   0xc   :  { %334 = vlog2.f32 %v107_v20  ;;  %v168_v17 = vmul.f32 14.0, %v325_v1  ;;  %vm172_vm2 = vcmp.lt.f32.partialorder %v391_v14, 0.5  ;;  %vm173_vm3 = vcmp.lt.f32.partialorder %v394_v16, 0.5 }
   0xd   :  { %336 = vlog2.f32 %v108_v21 }
   0xe   :  { %338 = vlog2.f32 %v109_v23  ;;  %v169_v23 = vmul.f32 14.0, %v326_v8 }
  0x15   :  { %v333_v24 = vpop.eup %332 }
  0x16   :  { %v335_v25 = vpop.eup %334  ;;  %v111_v26 = vmul.f32 0.6931472, %v333_v24 }
  0x17   :  { %v337_v27 = vpop.eup %336  ;;  %v113_v28 = vmul.f32 0.6931472, %v335_v25 }
  0x18   :  { %v118_v29 = vmul.f32 1.1, %v111_v26  ;;  %v115_v30 = vmul.f32 0.6931472, %v337_v27  ;;  %v339_v31 = vpop.eup %338 }
  0x19   :  { %v119_v32 = vmul.f32 1.1, %v113_v28  ;;  %v117_v35 = vmul.f32 0.6931472, %v339_v31 }
  0x1a   :  { %v122_v33 = vmul.f32 1.442695, %v118_v29  ;;  %v120_v34 = vmul.f32 1.1, %v115_v30 }
  0x1b   :  { %v124_v36 = vmul.f32 1.442695, %v119_v32  ;;  %v121_v38 = vmul.f32 1.1, %v117_v35 }
  0x1c   :  { %340 = vpow2.f32 %v122_v33  ;;  %v126_v37 = vmul.f32 1.442695, %v120_v34 }
  0x1d   :  { %342 = vpow2.f32 %v124_v36  ;;  %v128_v39 = vmul.f32 1.442695, %v121_v38 }
  0x1e   :  { %344 = vpow2.f32 %v126_v37 }
  0x1f   :  { %346 = vpow2.f32 %v128_v39 }
  0x26   :  { %v341_v40 = vpop.eup %340 }
  0x27   :  { %v343_v41 = vpop.eup %342  ;;  %v130_v42 = vmul.f32 0.25, %v341_v40 }
  0x28   :  { %v345_v43 = vpop.eup %344  ;;  %v131_v44 = vmul.f32 0.25, %v343_v41 }
  0x29   :  { %v134_v45 = vsub.f32 0.33333334, %v130_v42  ;;  %v132_v46 = vmul.f32 0.25, %v345_v43  ;;  %v347_v47 = vpop.eup %346 }
  0x2a   :  { %v135_v48 = vsub.f32 0.33333334, %v131_v44  ;;  %v133_v51 = vmul.f32 0.25, %v347_v47 }
  0x2b   :  { %v138_v49 = vmul.f32 %v341_v40, %v134_v45  ;;  %v136_v50 = vsub.f32 0.33333334, %v132_v46 }
  0x2c   :  { %v139_v52 = vmul.f32 %v343_v41, %v135_v48  ;;  %v137_v55 = vsub.f32 0.33333334, %v133_v51 }
  0x2d   :  { %v142_v53 = vadd.f32 -0.5, %v138_v49  ;;  %v140_v54 = vmul.f32 %v345_v43, %v136_v50 }
  0x2e   :  { %v143_v57 = vadd.f32 -0.5, %v139_v52  ;;  %v141_v60 = vmul.f32 %v347_v47, %v137_v55 }
  0x2f   :  { %v146_v58 = vmul.f32 %v341_v40, %v142_v53  ;;  %v144_v59 = vadd.f32 -0.5, %v140_v54 }
  0x30   :  { %v147_v61 = vmul.f32 %v343_v41, %v143_v57  ;;  %v145_v2 = vadd.f32 -0.5, %v141_v60 }
  0x31   :  { %v150_v63 = vadd.f32 1.0, %v146_v58  ;;  %v148_v0 = vmul.f32 %v345_v43, %v144_v59 }
  0x32   :  { %v151_v4 = vadd.f32 1.0, %v147_v61  ;;  %v149_v7 = vmul.f32 %v347_v47, %v145_v2 }
  0x33   :  { %v154_v5 = vmul.f32 %v341_v40, %v150_v63  ;;  %v152_v6 = vadd.f32 1.0, %v148_v0 }
  0x34   :  { %v155_v9 = vmul.f32 %v343_v41, %v151_v4  ;;  %v153_v18 = vadd.f32 1.0, %v149_v7 }
  0x35   :  { %v158_v12 = vmul.f32 14.0, %v154_v5  ;;  %v156_v15 = vmul.f32 %v345_v43, %v152_v6 }
  0x36   :  { %v159_v19 = vmul.f32 14.0, %v155_v9  ;;  %v157_v22 = vmul.f32 %v347_v47, %v153_v18 }
  0x37   :  { %v174_v20 = vsel %vm170_vm0, %v158_v12, %v166_v3  ;;  %v160_v21 = vmul.f32 14.0, %v156_v15 }
  0x38   :  { %v175_v24 = vsel %vm171_vm1, %v159_v19, %v167_v10  ;;  %v161_v11 = vmul.f32 14.0, %v157_v22  ;;  %186 = vst [vmem:[%s421_s2] sm:$0xff] %v174_v20 }
  0x39   :  { %v176_v25 = vsel %vm172_vm2, %v160_v21, %v168_v17  ;;  %187 = vst [vmem:[%s421_s2 + $0x8] sm:$0xff] %v175_v24 }
  0x3a   :  { %v177_v13 = vsel %vm173_vm3, %v161_v11, %v169_v23  ;;  %188 = vst [vmem:[%s421_s2 + $0x10] sm:$0xff] %v176_v25 }
  0x3b   :  { %189 = vst [vmem:[%s421_s2 + $0x18] sm:$0xff] %v177_v13 }

</bundles_post_ra>
